<compile_context>
chip_gen: v7x
topology: tpu7x:2x2x1
jax: 0.10.0
libtpu: 0.0.40
codegen_flags: <defaults>
</compile_context>

<pallas_src>
import math
import functools

import jax
import jax.numpy as jnp
import numpy as np
from jax.experimental import pallas as pl
from jax.experimental.pallas import tpu as pltpu

# ----------------------------- configuration ------------------------------
BATCH = 8
INPUT_DIM = 128
HIDDEN_DIM = 64
LATENT_DIM = 32
LN_EPS = 0.1                                             # Encoder LayerNorm eps
MIXTURE_WEIGHTS = (3.0 / 20.0, 3.0 / 4.0, 1.0 / 10.0)    # RecVAE defaults
LOG2PI = math.log(2.0 * math.pi)


# ------------------------------ kernel body --------------------------------
def _res_block(pre, gamma, beta):
    """swish -> LayerNorm(eps=LN_EPS); var = E[a^2]-mu^2, rsqrt on the EUP."""
    act = pre * jax.nn.sigmoid(pre)
    mu = jnp.mean(act, axis=-1, keepdims=True)
    var = jnp.mean(act * act, axis=-1, keepdims=True) - mu * mu
    return (act - mu) * jax.lax.rsqrt(var + LN_EPS) * gamma + beta


def composite_prior_kernel(log_w_post,
                           x_ref, z_ref, w1_ref, wres_ref, whead_ref,
                           vec_ref, prior_ref, out_ref):
    x = x_ref[...]                 # (TB, INPUT_DIM)  f32
    z = z_ref[...]                 # (TB, LATENT_DIM) f32
    vecs = vec_ref[...]            # (16, HIDDEN_DIM) packed biases / LN params, f32
    priors = prior_ref[...]        # (5, LATENT_DIM)  mu_p / a_p / c_p / a_u / c_u

    def row(i):                    # one packed (1, HIDDEN_DIM) vector
        return vecs[i:i + 1, :]

    # F.normalize(x): x / max(||x||_2, 1e-12)  ==  x * rsqrt(max(sumsq, 1e-24))
    sumsq = jnp.sum(x * x, axis=-1, keepdims=True)
    xn = x * jax.lax.rsqrt(jnp.maximum(sumsq, 1e-24))
    # dropout_prob = 0 in CompositePrior.forward -> dropout is the identity.

    def lin(a, w, b):
        # bf16 operands on the MXU, f32 accumulation, f32 bias add.
        return jnp.dot(a.astype(jnp.bfloat16), w,
                       preferred_element_type=jnp.float32) + b

    # layer 1
    h = _res_block(lin(xn, w1_ref[...], row(0)), row(5), row(10))
    acc = h                                           # running residual sum
    # layers 2..5: pre-activation += running sum of all previous h_i
    for i in range(4):
        pre = lin(h, wres_ref[i], row(1 + i)) + acc
        h = _res_block(pre, row(6 + i), row(11 + i))
        acc = acc + h

    # fused mu/logvar head: single (HIDDEN_DIM, 2*LATENT_DIM) matmul, static split
    b_head = row(15)[:, :2 * LATENT_DIM]
    head = lin(h, whead_ref[...], b_head)             # (TB, 2*LATENT_DIM)
    post_mu = head[:, :LATENT_DIM]
    post_logvar = head[:, LATENT_DIM:]

    mu_p = priors[0:1, :]
    a_p = priors[1:2, :]          # -0.5 * exp(-logvar_prior)
    c_p = priors[2:3, :]          # log(w0) - 0.5*(logvar_prior + log 2pi)
    a_u = priors[3:4, :]          # -0.5 * exp(-logvar_uniform)
    c_u = priors[4:5, :]          # log(w2) - 0.5*(logvar_uniform + log 2pi)

    zc2 = (z - mu_p) ** 2
    stnd = a_p * zc2 + c_p
    unif = a_u * zc2 + c_u
    post = (-0.5 * (post_logvar + LOG2PI
                    + (z - post_mu) ** 2 * jnp.exp(-post_logvar)) + log_w_post)

    # stable logsumexp over the 3 mixture components
    m = jnp.maximum(jnp.maximum(stnd, post), unif)
    # TODO(synk): if stores show up on the critical path at large tile_b,
    # present a lane-dense (B/4, 128) output slab instead of (B, 32).
    out_ref[...] = m + jnp.log(
        jnp.exp(stnd - m) + jnp.exp(post - m) + jnp.exp(unif - m))


# --------------------------- host-side packing ------------------------------
def pack_params(params, mix_log_w):
    (w1, b1, w2, b2, w3, b3, w4, b4, w5, b5,
     g1, be1, g2, be2, g3, be3, g4, be4, g5, be5,
     wmu, bmu, wlv, blv, mu_p, lv_p, lv_u) = params

    assert 2 * LATENT_DIM <= HIDDEN_DIM, \
        "packed head bias requires 2*latent_dim <= hidden_dim"

    w1b = w1.astype(jnp.bfloat16)                               # (I, H)
    wres = jnp.stack([w2, w3, w4, w5], axis=0).astype(jnp.bfloat16)   # (4, H, H)
    whead = jnp.concatenate([wmu, wlv], axis=1).astype(jnp.bfloat16)  # (H, 2L)

    bhead = jnp.concatenate([bmu, blv], axis=1)                 # (1, 2L)
    bhead = jnp.pad(bhead, ((0, 0), (0, HIDDEN_DIM - bhead.shape[1])))
    vecs = jnp.concatenate(
        [b1, b2, b3, b4, b5, g1, g2, g3, g4, g5,
         be1, be2, be3, be4, be5, bhead], axis=0)               # (16, H) f32

    # Constant-prior coefficients (folds two exps + mixture log-weights host-side)
    a_p = -0.5 * jnp.exp(-lv_p)
    c_p = mix_log_w[0] - 0.5 * (lv_p + LOG2PI)
    a_u = -0.5 * jnp.exp(-lv_u)
    c_u = mix_log_w[2] - 0.5 * (lv_u + LOG2PI)
    priors = jnp.concatenate([mu_p, a_p, c_p, a_u, c_u], axis=0)  # (5, L) f32

    return w1b, wres, whead, vecs, priors


def _vmem_budget_bytes(tile_b):
    """Explicit scoped-VMEM budget from the per-tile footprint (lane-padded)."""
    weight_bytes = ((INPUT_DIM * 128 + 4 * HIDDEN_DIM * 128 + HIDDEN_DIM * 128) * 2
                    + (16 + 8) * 128 * 4)            # bf16 weights + f32 slabs
    per_row = 4 * (2 * (INPUT_DIM + 2 * LATENT_DIM)  # x/z/out double-buffered
                   + 2 * INPUT_DIM                   # xn / sumsq temporaries
                   + 12 * HIDDEN_DIM)                # h / acc / pre / LN temps
    needed = tile_b * per_row + 2 * weight_bytes
    # clamp to [32 MiB, 64 MiB]: valid on v5e/v6e (128 MiB) and v7x (64 MiB)
    return int(min(64 << 20, max(32 << 20, 2 * needed + (8 << 20))))


# ------------------------------ wrapper ------------------------------------
def composite_prior(x, z, params, *, tile_b=None):
    B = x.shape[0]
    mix_log_w = tuple(float(np.log(w)) for w in MIXTURE_WEIGHTS)
    w1, wres, whead, vecs, priors = pack_params(params, mix_log_w)

    if tile_b is None:
        # Big tiles amortize the ~0.35us/step overhead and fill the MXU in M.
        # TODO(synk): on v7x (2 TC/chip) prefer tile_b <= B//2 so the parallel
        # grid axis has >=2 steps and both TensorCores are used.
        cap = 4096
        tile_b = B if B <= cap else cap
        while B % tile_b or tile_b % 8:
            tile_b -= 8
    assert B % tile_b == 0 and tile_b % 8 == 0, \
        "batch tile must divide B and be a multiple of 8"
    grid = (B // tile_b,)

    kernel = functools.partial(composite_prior_kernel, mix_log_w[1])

    batch_map = lambda i: (i, 0)
    const2 = lambda i: (0, 0)
    const3 = lambda i: (0, 0, 0)

    flops = 2 * B * (INPUT_DIM * HIDDEN_DIM
                     + 4 * HIDDEN_DIM * HIDDEN_DIM
                     + HIDDEN_DIM * 2 * LATENT_DIM)
    transcendentals = B * (5 * HIDDEN_DIM + 5 * LATENT_DIM)
    weight_bytes = (w1.size + wres.size + whead.size) * 2 + (vecs.size + priors.size) * 4
    bytes_accessed = B * 4 * (INPUT_DIM + 2 * LATENT_DIM) + weight_bytes

    return pl.pallas_call(
        kernel,
        out_shape=jax.ShapeDtypeStruct((B, LATENT_DIM), jnp.float32),
        grid_spec=pltpu.PrefetchScalarGridSpec(
            num_scalar_prefetch=0,
            grid=grid,
            in_specs=[
                pl.BlockSpec((tile_b, INPUT_DIM), batch_map),              # x
                pl.BlockSpec((tile_b, LATENT_DIM), batch_map),             # z
                pl.BlockSpec((INPUT_DIM, HIDDEN_DIM), const2),             # w1 (bf16)
                pl.BlockSpec((4, HIDDEN_DIM, HIDDEN_DIM), const3),         # w2..w5 (bf16)
                pl.BlockSpec((HIDDEN_DIM, 2 * LATENT_DIM), const2),        # fused head W (bf16)
                pl.BlockSpec((16, HIDDEN_DIM), const2),                    # packed vecs (f32)
                pl.BlockSpec((5, LATENT_DIM), const2),                     # packed priors (f32)
            ],
            out_specs=pl.BlockSpec((tile_b, LATENT_DIM), batch_map),
        ),
        compiler_params=pltpu.CompilerParams(
            dimension_semantics=("parallel",),
            vmem_limit_bytes=_vmem_budget_bytes(tile_b)),
        cost_estimate=pl.CostEstimate(
            flops=flops, transcendentals=transcendentals,
            bytes_accessed=bytes_accessed),
    )(x, z, w1, wres, whead, vecs, priors)


# ------------------------- parameter construction --------------------------
def make_params(key):
    """Deterministic synthetic parameters (shapes from CompositePrior.__init__)."""
    ks = jax.random.split(key, 16)
    it = iter(range(16))

    def lin(k_w, k_b, fan_in, fan_out):
        bound = 1.0 / math.sqrt(fan_in)
        w = jax.random.uniform(k_w, (fan_in, fan_out), jnp.float32, -bound, bound)
        b = jax.random.uniform(k_b, (1, fan_out), jnp.float32, -bound, bound)
        return w, b

    w1, b1 = lin(ks[next(it)], ks[next(it)], INPUT_DIM, HIDDEN_DIM)
    w2, b2 = lin(ks[next(it)], ks[next(it)], HIDDEN_DIM, HIDDEN_DIM)
    w3, b3 = lin(ks[next(it)], ks[next(it)], HIDDEN_DIM, HIDDEN_DIM)
    w4, b4 = lin(ks[next(it)], ks[next(it)], HIDDEN_DIM, HIDDEN_DIM)
    w5, b5 = lin(ks[next(it)], ks[next(it)], HIDDEN_DIM, HIDDEN_DIM)
    wmu, bmu = lin(ks[next(it)], ks[next(it)], HIDDEN_DIM, LATENT_DIM)
    wlv, blv = lin(ks[next(it)], ks[next(it)], HIDDEN_DIM, LATENT_DIM)

    ones = jnp.ones((1, HIDDEN_DIM), jnp.float32)
    zeros = jnp.zeros((1, HIDDEN_DIM), jnp.float32)
    ln = [ones, zeros] * 5  # gamma/beta for ln1..ln5 (PyTorch default init)

    mu_prior = jnp.zeros((1, LATENT_DIM), jnp.float32)             # fill_(0)
    logvar_prior = jnp.zeros((1, LATENT_DIM), jnp.float32)         # fill_(0)
    logvar_uniform = jnp.full((1, LATENT_DIM), 10.0, jnp.float32)  # fill_(10)

    return [w1, b1, w2, b2, w3, b3, w4, b4, w5, b5,
            *ln,
            wmu, bmu, wlv, blv,
            mu_prior, logvar_prior, logvar_uniform]


# ----------------- references (matched-numerics + pure f32) -----------------
def reference_matched(x, z, params):
    """Same math as the kernel (bf16 matmul operands, f32 accum) in plain JAX."""
    mix_log_w = tuple(float(np.log(w)) for w in MIXTURE_WEIGHTS)
    w1, wres, whead, vecs, priors = pack_params(params, mix_log_w)

    def row(i):
        return vecs[i:i + 1, :]

    def lin(a, w, b):
        return jnp.dot(a.astype(jnp.bfloat16), w,
                       preferred_element_type=jnp.float32) + b

    sumsq = jnp.sum(x * x, axis=-1, keepdims=True)
    xn = x * jax.lax.rsqrt(jnp.maximum(sumsq, 1e-24))

    h = _res_block(lin(xn, w1, row(0)), row(5), row(10))
    acc = h
    for i in range(4):
        pre = lin(h, wres[i], row(1 + i)) + acc
        h = _res_block(pre, row(6 + i), row(11 + i))
        acc = acc + h

    head = lin(h, whead, row(15)[:, :2 * LATENT_DIM])
    pm, plv = head[:, :LATENT_DIM], head[:, LATENT_DIM:]

    mu_p, a_p, c_p, a_u, c_u = [priors[i:i + 1] for i in range(5)]
    zc2 = (z - mu_p) ** 2
    stnd = a_p * zc2 + c_p
    unif = a_u * zc2 + c_u
    post = -0.5 * (plv + LOG2PI + (z - pm) ** 2 * jnp.exp(-plv)) + mix_log_w[1]
    m = jnp.maximum(jnp.maximum(stnd, post), unif)
    return m + jnp.log(jnp.exp(stnd - m) + jnp.exp(post - m) + jnp.exp(unif - m))


def reference_f32(x, z, params):
    """Direct f32 translation of the PyTorch module (the spec)."""
    (w1, b1, w2, b2, w3, b3, w4, b4, w5, b5,
     g1, be1, g2, be2, g3, be3, g4, be4, g5, be5,
     wmu, bmu, wlv, blv, mu_p, lv_p, lv_u) = params

    def ln(t, g, b):
        mu = jnp.mean(t, axis=-1, keepdims=True)
        var = jnp.mean((t - mu) ** 2, axis=-1, keepdims=True)
        return (t - mu) / jnp.sqrt(var + LN_EPS) * g + b

    def sw(t):
        return t * jax.nn.sigmoid(t)

    xn = x / jnp.maximum(jnp.linalg.norm(x, axis=-1, keepdims=True), 1e-12)
    h1 = ln(sw(xn @ w1 + b1), g1, be1)
    h2 = ln(sw(h1 @ w2 + b2 + h1), g2, be2)
    h3 = ln(sw(h2 @ w3 + b3 + h1 + h2), g3, be3)
    h4 = ln(sw(h3 @ w4 + b4 + h1 + h2 + h3), g4, be4)
    h5 = ln(sw(h4 @ w5 + b5 + h1 + h2 + h3 + h4), g5, be5)
    pm = h5 @ wmu + bmu
    plv = h5 @ wlv + blv

    def lnp(zz, mu, logvar):
        return -0.5 * (logvar + LOG2PI + (zz - mu) ** 2 / jnp.exp(logvar))

    gs = [lnp(z, mu_p, lv_p), lnp(z, pm, plv), lnp(z, mu_p, lv_u)]
    gs = [g + np.log(w) for g, w in zip(gs, MIXTURE_WEIGHTS)]
    return jax.scipy.special.logsumexp(jnp.stack(gs, axis=-1), axis=-1)


# --------------------------------- main -------------------------------------
if __name__ == "__main__":
    key = jax.random.PRNGKey(0)
    kx, kz, kp = jax.random.split(key, 3)

    # x: implicit-feedback interaction vector (non-negative), z: latent sample
    x = jax.random.uniform(kx, (BATCH, INPUT_DIM), jnp.float32)
    z = jax.random.normal(kz, (BATCH, LATENT_DIM), jnp.float32)
    params = make_params(kp)

    out = jax.block_until_ready(composite_prior(x, z, params))

    # Tight check against a reference with identical bf16-matmul numerics.
    matched = reference_matched(x, z, params)
    np.testing.assert_allclose(np.asarray(out), np.asarray(matched),
                               rtol=1e-3, atol=1e-3)

    # Loose check against the pure-f32 PyTorch-equivalent spec (bf16 MXU
    # operands introduce ~1e-2-level numeric differences; semantics unchanged).
    ref = reference_f32(x, z, params)
    np.testing.assert_allclose(np.asarray(out), np.asarray(ref),
                               rtol=1e-1, atol=1e-1)

    print("KERNEL_OK")
</pallas_src>

<mosaic_0001>
module attributes {stable_mosaic.version = 11 : i64} {
  func.func @composite_prior_kernel(%arg0: i32, %arg1: memref<8x128xf32, #tpu.memory_space<vmem>>, %arg2: memref<8x32xf32, #tpu.memory_space<vmem>>, %arg3: memref<128x64xbf16, #tpu.memory_space<vmem>>, %arg4: memref<4x64x64xbf16, #tpu.memory_space<vmem>>, %arg5: memref<64x64xbf16, #tpu.memory_space<vmem>>, %arg6: memref<16x64xf32, #tpu.memory_space<vmem>>, %arg7: memref<5x32xf32, #tpu.memory_space<vmem>>, %arg8: memref<8x32xf32, #tpu.memory_space<vmem>>) attributes {dimension_semantics = [#tpu.dimension_semantics<parallel>], iteration_bounds = array<i64: 1>, scalar_prefetch = 0 : i64, scratch_operands = 0 : i64, tpu.core_type = #tpu.core_type<tc>, window_params = [{transform_indices = @transform_0, window_bounds = array<i64: 8, 128>}, {transform_indices = @transform_1, window_bounds = array<i64: 8, 32>}, {pipeline_mode = #tpu.pipeline_mode<synchronous>, transform_indices = @transform_2, window_bounds = array<i64: 128, 64>}, {pipeline_mode = #tpu.pipeline_mode<synchronous>, transform_indices = @transform_3, window_bounds = array<i64: 4, 64, 64>}, {pipeline_mode = #tpu.pipeline_mode<synchronous>, transform_indices = @transform_4, window_bounds = array<i64: 64, 64>}, {pipeline_mode = #tpu.pipeline_mode<synchronous>, transform_indices = @transform_5, window_bounds = array<i64: 16, 64>}, {pipeline_mode = #tpu.pipeline_mode<synchronous>, transform_indices = @transform_6, window_bounds = array<i64: 5, 32>}, {transform_indices = @transform_7, window_bounds = array<i64: 8, 32>}]} {
    %c0 = arith.constant 0 : index
    %c0_0 = arith.constant 0 : index
    %0 = vector.load %arg1[%c0, %c0_0] : memref<8x128xf32, #tpu.memory_space<vmem>>, vector<8x128xf32>
    %c0_1 = arith.constant 0 : index
    %c0_2 = arith.constant 0 : index
    %1 = vector.load %arg2[%c0_1, %c0_2] : memref<8x32xf32, #tpu.memory_space<vmem>>, vector<8x32xf32>
    %c0_3 = arith.constant 0 : index
    %c0_4 = arith.constant 0 : index
    %2 = vector.load %arg6[%c0_3, %c0_4] : memref<16x64xf32, #tpu.memory_space<vmem>>, vector<16x64xf32>
    %c0_5 = arith.constant 0 : index
    %c0_6 = arith.constant 0 : index
    %3 = vector.load %arg7[%c0_5, %c0_6] : memref<5x32xf32, #tpu.memory_space<vmem>>, vector<5x32xf32>
    %4 = arith.mulf %0, %0 : vector<8x128xf32>
    %cst = arith.constant dense<0.000000e+00> : vector<8xf32>
    %5 = vector.multi_reduction <add>, %4, %cst [1] : vector<8x128xf32> to vector<8xf32>
    %6 = vector.shape_cast %5 : vector<8xf32> to vector<8x1xf32>
    %cst_7 = arith.constant 1.000000e-24 : f32
    %7 = vector.broadcast %cst_7 : f32 to vector<8x1xf32>
    %8 = arith.maximumf %6, %7 : vector<8x1xf32>
    %9 = math.rsqrt %8 : vector<8x1xf32>
    %10 = vector.broadcast %9 : vector<8x1xf32> to vector<8x128xf32>
    %11 = arith.mulf %0, %10 : vector<8x128xf32>
    %c0_8 = arith.constant 0 : index
    %c0_9 = arith.constant 0 : index
    %12 = vector.load %arg3[%c0_8, %c0_9] : memref<128x64xbf16, #tpu.memory_space<vmem>>, vector<128x64xbf16>
    %13 = vector.extract_strided_slice %2 {offsets = [0, 0], sizes = [1, 64], strides = [1, 1]} : vector<16x64xf32> to vector<1x64xf32>
    %14 = arith.truncf %11 : vector<8x128xf32> to vector<8x128xbf16>
    %cst_10 = arith.constant dense<0.000000e+00> : vector<8x64xf32>
    %15 = tpu.matmul %14, %12, %cst_10 {dimension_numbers = #tpu.dot_dimension_numbers<[1], [0], [0], [1], [0, 0, 1, 1], [], []>} : vector<8x128xbf16>, vector<128x64xbf16>, vector<8x64xf32> -> vector<8x64xf32>
    %16 = vector.broadcast %13 : vector<1x64xf32> to vector<8x64xf32>
    %17 = arith.addf %15, %16 : vector<8x64xf32>
    %18 = vector.extract_strided_slice %2 {offsets = [5, 0], sizes = [1, 64], strides = [1, 1]} : vector<16x64xf32> to vector<1x64xf32>
    %19 = vector.extract_strided_slice %2 {offsets = [10, 0], sizes = [1, 64], strides = [1, 1]} : vector<16x64xf32> to vector<1x64xf32>
    %20 = arith.negf %17 : vector<8x64xf32>
    %21 = math.exp %20 : vector<8x64xf32>
    %cst_11 = arith.constant 1.000000e+00 : f32
    %22 = vector.broadcast %cst_11 : f32 to vector<8x64xf32>
    %23 = arith.addf %22, %21 : vector<8x64xf32>
    %24 = arith.divf %22, %23 : vector<8x64xf32>
    %25 = arith.mulf %17, %24 : vector<8x64xf32>
    %cst_12 = arith.constant dense<0.000000e+00> : vector<8xf32>
    %26 = vector.multi_reduction <add>, %25, %cst_12 [1] : vector<8x64xf32> to vector<8xf32>
    %27 = vector.shape_cast %26 : vector<8xf32> to vector<8x1xf32>
    %cst_13 = arith.constant 6.400000e+01 : f32
    %28 = vector.broadcast %cst_13 : f32 to vector<8x1xf32>
    %29 = arith.divf %27, %28 : vector<8x1xf32>
    %30 = arith.mulf %25, %25 : vector<8x64xf32>
    %cst_14 = arith.constant dense<0.000000e+00> : vector<8xf32>
    %31 = vector.multi_reduction <add>, %30, %cst_14 [1] : vector<8x64xf32> to vector<8xf32>
    %32 = vector.shape_cast %31 : vector<8xf32> to vector<8x1xf32>
    %cst_15 = arith.constant 6.400000e+01 : f32
    %33 = vector.broadcast %cst_15 : f32 to vector<8x1xf32>
    %34 = arith.divf %32, %33 : vector<8x1xf32>
    %35 = arith.mulf %29, %29 : vector<8x1xf32>
    %36 = arith.subf %34, %35 : vector<8x1xf32>
    %37 = vector.broadcast %29 : vector<8x1xf32> to vector<8x64xf32>
    %38 = arith.subf %25, %37 : vector<8x64xf32>
    %cst_16 = arith.constant 1.000000e-01 : f32
    %39 = vector.broadcast %cst_16 : f32 to vector<8x1xf32>
    %40 = arith.addf %36, %39 : vector<8x1xf32>
    %41 = math.rsqrt %40 : vector<8x1xf32>
    %42 = vector.broadcast %41 : vector<8x1xf32> to vector<8x64xf32>
    %43 = arith.mulf %38, %42 : vector<8x64xf32>
    %44 = vector.broadcast %18 : vector<1x64xf32> to vector<8x64xf32>
    %45 = arith.mulf %43, %44 : vector<8x64xf32>
    %46 = vector.broadcast %19 : vector<1x64xf32> to vector<8x64xf32>
    %47 = arith.addf %45, %46 : vector<8x64xf32>
    %c0_17 = arith.constant 0 : index
    %c0_18 = arith.constant 0 : index
    %c0_19 = arith.constant 0 : index
    %48 = vector.load %arg4[%c0_17, %c0_18, %c0_19] : memref<4x64x64xbf16, #tpu.memory_space<vmem>>, vector<1x64x64xbf16>
    %49 = vector.shape_cast %48 : vector<1x64x64xbf16> to vector<64x64xbf16>
    %50 = vector.extract_strided_slice %2 {offsets = [1, 0], sizes = [1, 64], strides = [1, 1]} : vector<16x64xf32> to vector<1x64xf32>
    %51 = arith.truncf %47 : vector<8x64xf32> to vector<8x64xbf16>
    %cst_20 = arith.constant dense<0.000000e+00> : vector<8x64xf32>
    %52 = tpu.matmul %51, %49, %cst_20 {dimension_numbers = #tpu.dot_dimension_numbers<[1], [0], [0], [1], [0, 0, 1, 1], [], []>} : vector<8x64xbf16>, vector<64x64xbf16>, vector<8x64xf32> -> vector<8x64xf32>
    %53 = vector.broadcast %50 : vector<1x64xf32> to vector<8x64xf32>
    %54 = arith.addf %52, %53 : vector<8x64xf32>
    %55 = arith.addf %54, %47 : vector<8x64xf32>
    %56 = vector.extract_strided_slice %2 {offsets = [6, 0], sizes = [1, 64], strides = [1, 1]} : vector<16x64xf32> to vector<1x64xf32>
    %57 = vector.extract_strided_slice %2 {offsets = [11, 0], sizes = [1, 64], strides = [1, 1]} : vector<16x64xf32> to vector<1x64xf32>
    %58 = arith.negf %55 : vector<8x64xf32>
    %59 = math.exp %58 : vector<8x64xf32>
    %cst_21 = arith.constant 1.000000e+00 : f32
    %60 = vector.broadcast %cst_21 : f32 to vector<8x64xf32>
    %61 = arith.addf %60, %59 : vector<8x64xf32>
    %62 = arith.divf %60, %61 : vector<8x64xf32>
    %63 = arith.mulf %55, %62 : vector<8x64xf32>
    %cst_22 = arith.constant dense<0.000000e+00> : vector<8xf32>
    %64 = vector.multi_reduction <add>, %63, %cst_22 [1] : vector<8x64xf32> to vector<8xf32>
    %65 = vector.shape_cast %64 : vector<8xf32> to vector<8x1xf32>
    %cst_23 = arith.constant 6.400000e+01 : f32
    %66 = vector.broadcast %cst_23 : f32 to vector<8x1xf32>
    %67 = arith.divf %65, %66 : vector<8x1xf32>
    %68 = arith.mulf %63, %63 : vector<8x64xf32>
    %cst_24 = arith.constant dense<0.000000e+00> : vector<8xf32>
    %69 = vector.multi_reduction <add>, %68, %cst_24 [1] : vector<8x64xf32> to vector<8xf32>
    %70 = vector.shape_cast %69 : vector<8xf32> to vector<8x1xf32>
    %cst_25 = arith.constant 6.400000e+01 : f32
    %71 = vector.broadcast %cst_25 : f32 to vector<8x1xf32>
    %72 = arith.divf %70, %71 : vector<8x1xf32>
    %73 = arith.mulf %67, %67 : vector<8x1xf32>
    %74 = arith.subf %72, %73 : vector<8x1xf32>
    %75 = vector.broadcast %67 : vector<8x1xf32> to vector<8x64xf32>
    %76 = arith.subf %63, %75 : vector<8x64xf32>
    %cst_26 = arith.constant 1.000000e-01 : f32
    %77 = vector.broadcast %cst_26 : f32 to vector<8x1xf32>
    %78 = arith.addf %74, %77 : vector<8x1xf32>
    %79 = math.rsqrt %78 : vector<8x1xf32>
    %80 = vector.broadcast %79 : vector<8x1xf32> to vector<8x64xf32>
    %81 = arith.mulf %76, %80 : vector<8x64xf32>
    %82 = vector.broadcast %56 : vector<1x64xf32> to vector<8x64xf32>
    %83 = arith.mulf %81, %82 : vector<8x64xf32>
    %84 = vector.broadcast %57 : vector<1x64xf32> to vector<8x64xf32>
    %85 = arith.addf %83, %84 : vector<8x64xf32>
    %86 = arith.addf %47, %85 : vector<8x64xf32>
    %c1 = arith.constant 1 : index
    %c0_27 = arith.constant 0 : index
    %c0_28 = arith.constant 0 : index
    %87 = vector.load %arg4[%c1, %c0_27, %c0_28] : memref<4x64x64xbf16, #tpu.memory_space<vmem>>, vector<1x64x64xbf16>
    %88 = vector.shape_cast %87 : vector<1x64x64xbf16> to vector<64x64xbf16>
    %89 = vector.extract_strided_slice %2 {offsets = [2, 0], sizes = [1, 64], strides = [1, 1]} : vector<16x64xf32> to vector<1x64xf32>
    %90 = arith.truncf %85 : vector<8x64xf32> to vector<8x64xbf16>
    %cst_29 = arith.constant dense<0.000000e+00> : vector<8x64xf32>
    %91 = tpu.matmul %90, %88, %cst_29 {dimension_numbers = #tpu.dot_dimension_numbers<[1], [0], [0], [1], [0, 0, 1, 1], [], []>} : vector<8x64xbf16>, vector<64x64xbf16>, vector<8x64xf32> -> vector<8x64xf32>
    %92 = vector.broadcast %89 : vector<1x64xf32> to vector<8x64xf32>
    %93 = arith.addf %91, %92 : vector<8x64xf32>
    %94 = arith.addf %93, %86 : vector<8x64xf32>
    %95 = vector.extract_strided_slice %2 {offsets = [7, 0], sizes = [1, 64], strides = [1, 1]} : vector<16x64xf32> to vector<1x64xf32>
    %96 = vector.extract_strided_slice %2 {offsets = [12, 0], sizes = [1, 64], strides = [1, 1]} : vector<16x64xf32> to vector<1x64xf32>
    %97 = arith.negf %94 : vector<8x64xf32>
    %98 = math.exp %97 : vector<8x64xf32>
    %cst_30 = arith.constant 1.000000e+00 : f32
    %99 = vector.broadcast %cst_30 : f32 to vector<8x64xf32>
    %100 = arith.addf %99, %98 : vector<8x64xf32>
    %101 = arith.divf %99, %100 : vector<8x64xf32>
    %102 = arith.mulf %94, %101 : vector<8x64xf32>
    %cst_31 = arith.constant dense<0.000000e+00> : vector<8xf32>
    %103 = vector.multi_reduction <add>, %102, %cst_31 [1] : vector<8x64xf32> to vector<8xf32>
    %104 = vector.shape_cast %103 : vector<8xf32> to vector<8x1xf32>
    %cst_32 = arith.constant 6.400000e+01 : f32
    %105 = vector.broadcast %cst_32 : f32 to vector<8x1xf32>
    %106 = arith.divf %104, %105 : vector<8x1xf32>
    %107 = arith.mulf %102, %102 : vector<8x64xf32>
    %cst_33 = arith.constant dense<0.000000e+00> : vector<8xf32>
    %108 = vector.multi_reduction <add>, %107, %cst_33 [1] : vector<8x64xf32> to vector<8xf32>
    %109 = vector.shape_cast %108 : vector<8xf32> to vector<8x1xf32>
    %cst_34 = arith.constant 6.400000e+01 : f32
    %110 = vector.broadcast %cst_34 : f32 to vector<8x1xf32>
    %111 = arith.divf %109, %110 : vector<8x1xf32>
    %112 = arith.mulf %106, %106 : vector<8x1xf32>
    %113 = arith.subf %111, %112 : vector<8x1xf32>
    %114 = vector.broadcast %106 : vector<8x1xf32> to vector<8x64xf32>
    %115 = arith.subf %102, %114 : vector<8x64xf32>
    %cst_35 = arith.constant 1.000000e-01 : f32
    %116 = vector.broadcast %cst_35 : f32 to vector<8x1xf32>
    %117 = arith.addf %113, %116 : vector<8x1xf32>
    %118 = math.rsqrt %117 : vector<8x1xf32>
    %119 = vector.broadcast %118 : vector<8x1xf32> to vector<8x64xf32>
    %120 = arith.mulf %115, %119 : vector<8x64xf32>
    %121 = vector.broadcast %95 : vector<1x64xf32> to vector<8x64xf32>
    %122 = arith.mulf %120, %121 : vector<8x64xf32>
    %123 = vector.broadcast %96 : vector<1x64xf32> to vector<8x64xf32>
    %124 = arith.addf %122, %123 : vector<8x64xf32>
    %125 = arith.addf %86, %124 : vector<8x64xf32>
    %c2 = arith.constant 2 : index
    %c0_36 = arith.constant 0 : index
    %c0_37 = arith.constant 0 : index
    %126 = vector.load %arg4[%c2, %c0_36, %c0_37] : memref<4x64x64xbf16, #tpu.memory_space<vmem>>, vector<1x64x64xbf16>
    %127 = vector.shape_cast %126 : vector<1x64x64xbf16> to vector<64x64xbf16>
    %128 = vector.extract_strided_slice %2 {offsets = [3, 0], sizes = [1, 64], strides = [1, 1]} : vector<16x64xf32> to vector<1x64xf32>
    %129 = arith.truncf %124 : vector<8x64xf32> to vector<8x64xbf16>
    %cst_38 = arith.constant dense<0.000000e+00> : vector<8x64xf32>
    %130 = tpu.matmul %129, %127, %cst_38 {dimension_numbers = #tpu.dot_dimension_numbers<[1], [0], [0], [1], [0, 0, 1, 1], [], []>} : vector<8x64xbf16>, vector<64x64xbf16>, vector<8x64xf32> -> vector<8x64xf32>
    %131 = vector.broadcast %128 : vector<1x64xf32> to vector<8x64xf32>
    %132 = arith.addf %130, %131 : vector<8x64xf32>
    %133 = arith.addf %132, %125 : vector<8x64xf32>
    %134 = vector.extract_strided_slice %2 {offsets = [8, 0], sizes = [1, 64], strides = [1, 1]} : vector<16x64xf32> to vector<1x64xf32>
    %135 = vector.extract_strided_slice %2 {offsets = [13, 0], sizes = [1, 64], strides = [1, 1]} : vector<16x64xf32> to vector<1x64xf32>
    %136 = arith.negf %133 : vector<8x64xf32>
    %137 = math.exp %136 : vector<8x64xf32>
    %cst_39 = arith.constant 1.000000e+00 : f32
    %138 = vector.broadcast %cst_39 : f32 to vector<8x64xf32>
    %139 = arith.addf %138, %137 : vector<8x64xf32>
    %140 = arith.divf %138, %139 : vector<8x64xf32>
    %141 = arith.mulf %133, %140 : vector<8x64xf32>
    %cst_40 = arith.constant dense<0.000000e+00> : vector<8xf32>
    %142 = vector.multi_reduction <add>, %141, %cst_40 [1] : vector<8x64xf32> to vector<8xf32>
    %143 = vector.shape_cast %142 : vector<8xf32> to vector<8x1xf32>
    %cst_41 = arith.constant 6.400000e+01 : f32
    %144 = vector.broadcast %cst_41 : f32 to vector<8x1xf32>
    %145 = arith.divf %143, %144 : vector<8x1xf32>
    %146 = arith.mulf %141, %141 : vector<8x64xf32>
    %cst_42 = arith.constant dense<0.000000e+00> : vector<8xf32>
    %147 = vector.multi_reduction <add>, %146, %cst_42 [1] : vector<8x64xf32> to vector<8xf32>
    %148 = vector.shape_cast %147 : vector<8xf32> to vector<8x1xf32>
    %cst_43 = arith.constant 6.400000e+01 : f32
    %149 = vector.broadcast %cst_43 : f32 to vector<8x1xf32>
    %150 = arith.divf %148, %149 : vector<8x1xf32>
    %151 = arith.mulf %145, %145 : vector<8x1xf32>
    %152 = arith.subf %150, %151 : vector<8x1xf32>
    %153 = vector.broadcast %145 : vector<8x1xf32> to vector<8x64xf32>
    %154 = arith.subf %141, %153 : vector<8x64xf32>
    %cst_44 = arith.constant 1.000000e-01 : f32
    %155 = vector.broadcast %cst_44 : f32 to vector<8x1xf32>
    %156 = arith.addf %152, %155 : vector<8x1xf32>
    %157 = math.rsqrt %156 : vector<8x1xf32>
    %158 = vector.broadcast %157 : vector<8x1xf32> to vector<8x64xf32>
    %159 = arith.mulf %154, %158 : vector<8x64xf32>
    %160 = vector.broadcast %134 : vector<1x64xf32> to vector<8x64xf32>
    %161 = arith.mulf %159, %160 : vector<8x64xf32>
    %162 = vector.broadcast %135 : vector<1x64xf32> to vector<8x64xf32>
    %163 = arith.addf %161, %162 : vector<8x64xf32>
    %164 = arith.addf %125, %163 : vector<8x64xf32>
    %c3 = arith.constant 3 : index
    %c0_45 = arith.constant 0 : index
    %c0_46 = arith.constant 0 : index
    %165 = vector.load %arg4[%c3, %c0_45, %c0_46] : memref<4x64x64xbf16, #tpu.memory_space<vmem>>, vector<1x64x64xbf16>
    %166 = vector.shape_cast %165 : vector<1x64x64xbf16> to vector<64x64xbf16>
    %167 = vector.extract_strided_slice %2 {offsets = [4, 0], sizes = [1, 64], strides = [1, 1]} : vector<16x64xf32> to vector<1x64xf32>
    %168 = arith.truncf %163 : vector<8x64xf32> to vector<8x64xbf16>
    %cst_47 = arith.constant dense<0.000000e+00> : vector<8x64xf32>
    %169 = tpu.matmul %168, %166, %cst_47 {dimension_numbers = #tpu.dot_dimension_numbers<[1], [0], [0], [1], [0, 0, 1, 1], [], []>} : vector<8x64xbf16>, vector<64x64xbf16>, vector<8x64xf32> -> vector<8x64xf32>
    %170 = vector.broadcast %167 : vector<1x64xf32> to vector<8x64xf32>
    %171 = arith.addf %169, %170 : vector<8x64xf32>
    %172 = arith.addf %171, %164 : vector<8x64xf32>
    %173 = vector.extract_strided_slice %2 {offsets = [9, 0], sizes = [1, 64], strides = [1, 1]} : vector<16x64xf32> to vector<1x64xf32>
    %174 = vector.extract_strided_slice %2 {offsets = [14, 0], sizes = [1, 64], strides = [1, 1]} : vector<16x64xf32> to vector<1x64xf32>
    %175 = arith.negf %172 : vector<8x64xf32>
    %176 = math.exp %175 : vector<8x64xf32>
    %cst_48 = arith.constant 1.000000e+00 : f32
    %177 = vector.broadcast %cst_48 : f32 to vector<8x64xf32>
    %178 = arith.addf %177, %176 : vector<8x64xf32>
    %179 = arith.divf %177, %178 : vector<8x64xf32>
    %180 = arith.mulf %172, %179 : vector<8x64xf32>
    %cst_49 = arith.constant dense<0.000000e+00> : vector<8xf32>
    %181 = vector.multi_reduction <add>, %180, %cst_49 [1] : vector<8x64xf32> to vector<8xf32>
    %182 = vector.shape_cast %181 : vector<8xf32> to vector<8x1xf32>
    %cst_50 = arith.constant 6.400000e+01 : f32
    %183 = vector.broadcast %cst_50 : f32 to vector<8x1xf32>
    %184 = arith.divf %182, %183 : vector<8x1xf32>
    %185 = arith.mulf %180, %180 : vector<8x64xf32>
    %cst_51 = arith.constant dense<0.000000e+00> : vector<8xf32>
    %186 = vector.multi_reduction <add>, %185, %cst_51 [1] : vector<8x64xf32> to vector<8xf32>
    %187 = vector.shape_cast %186 : vector<8xf32> to vector<8x1xf32>
    %cst_52 = arith.constant 6.400000e+01 : f32
    %188 = vector.broadcast %cst_52 : f32 to vector<8x1xf32>
    %189 = arith.divf %187, %188 : vector<8x1xf32>
    %190 = arith.mulf %184, %184 : vector<8x1xf32>
    %191 = arith.subf %189, %190 : vector<8x1xf32>
    %192 = vector.broadcast %184 : vector<8x1xf32> to vector<8x64xf32>
    %193 = arith.subf %180, %192 : vector<8x64xf32>
    %cst_53 = arith.constant 1.000000e-01 : f32
    %194 = vector.broadcast %cst_53 : f32 to vector<8x1xf32>
    %195 = arith.addf %191, %194 : vector<8x1xf32>
    %196 = math.rsqrt %195 : vector<8x1xf32>
    %197 = vector.broadcast %196 : vector<8x1xf32> to vector<8x64xf32>
    %198 = arith.mulf %193, %197 : vector<8x64xf32>
    %199 = vector.broadcast %173 : vector<1x64xf32> to vector<8x64xf32>
    %200 = arith.mulf %198, %199 : vector<8x64xf32>
    %201 = vector.broadcast %174 : vector<1x64xf32> to vector<8x64xf32>
    %202 = arith.addf %200, %201 : vector<8x64xf32>
    %203 = vector.extract_strided_slice %2 {offsets = [15, 0], sizes = [1, 64], strides = [1, 1]} : vector<16x64xf32> to vector<1x64xf32>
    %c0_54 = arith.constant 0 : index
    %c0_55 = arith.constant 0 : index
    %204 = vector.load %arg5[%c0_54, %c0_55] : memref<64x64xbf16, #tpu.memory_space<vmem>>, vector<64x64xbf16>
    %205 = arith.truncf %202 : vector<8x64xf32> to vector<8x64xbf16>
    %cst_56 = arith.constant dense<0.000000e+00> : vector<8x64xf32>
    %206 = tpu.matmul %205, %204, %cst_56 {dimension_numbers = #tpu.dot_dimension_numbers<[1], [0], [0], [1], [0, 0, 1, 1], [], []>} : vector<8x64xbf16>, vector<64x64xbf16>, vector<8x64xf32> -> vector<8x64xf32>
    %207 = vector.broadcast %203 : vector<1x64xf32> to vector<8x64xf32>
    %208 = arith.addf %206, %207 : vector<8x64xf32>
    %209 = vector.extract_strided_slice %208 {offsets = [0, 0], sizes = [8, 32], strides = [1, 1]} : vector<8x64xf32> to vector<8x32xf32>
    %210 = vector.extract_strided_slice %208 {offsets = [0, 32], sizes = [8, 32], strides = [1, 1]} : vector<8x64xf32> to vector<8x32xf32>
    %211 = vector.extract_strided_slice %3 {offsets = [0, 0], sizes = [1, 32], strides = [1, 1]} : vector<5x32xf32> to vector<1x32xf32>
    %212 = vector.extract_strided_slice %3 {offsets = [1, 0], sizes = [1, 32], strides = [1, 1]} : vector<5x32xf32> to vector<1x32xf32>
    %213 = vector.extract_strided_slice %3 {offsets = [2, 0], sizes = [1, 32], strides = [1, 1]} : vector<5x32xf32> to vector<1x32xf32>
    %214 = vector.extract_strided_slice %3 {offsets = [3, 0], sizes = [1, 32], strides = [1, 1]} : vector<5x32xf32> to vector<1x32xf32>
    %215 = vector.extract_strided_slice %3 {offsets = [4, 0], sizes = [1, 32], strides = [1, 1]} : vector<5x32xf32> to vector<1x32xf32>
    %216 = vector.broadcast %211 : vector<1x32xf32> to vector<8x32xf32>
    %217 = arith.subf %1, %216 : vector<8x32xf32>
    %218 = arith.mulf %217, %217 : vector<8x32xf32>
    %219 = vector.broadcast %212 : vector<1x32xf32> to vector<8x32xf32>
    %220 = arith.mulf %219, %218 : vector<8x32xf32>
    %221 = vector.broadcast %213 : vector<1x32xf32> to vector<8x32xf32>
    %222 = arith.addf %220, %221 : vector<8x32xf32>
    %223 = vector.broadcast %214 : vector<1x32xf32> to vector<8x32xf32>
    %224 = arith.mulf %223, %218 : vector<8x32xf32>
    %225 = vector.broadcast %215 : vector<1x32xf32> to vector<8x32xf32>
    %226 = arith.addf %224, %225 : vector<8x32xf32>
    %cst_57 = arith.constant 1.83787704 : f32
    %227 = vector.broadcast %cst_57 : f32 to vector<8x32xf32>
    %228 = arith.addf %210, %227 : vector<8x32xf32>
    %229 = arith.subf %1, %209 : vector<8x32xf32>
    %230 = arith.mulf %229, %229 : vector<8x32xf32>
    %cst_58 = arith.constant 0.000000e+00 : f32
    %231 = vector.broadcast %cst_58 : f32 to vector<8x32xf32>
    %232 = arith.subf %231, %210 : vector<8x32xf32>
    %233 = math.exp %232 : vector<8x32xf32>
    %234 = arith.mulf %230, %233 : vector<8x32xf32>
    %235 = arith.addf %228, %234 : vector<8x32xf32>
    %cst_59 = arith.constant -5.000000e-01 : f32
    %236 = vector.broadcast %cst_59 : f32 to vector<8x32xf32>
    %237 = arith.mulf %236, %235 : vector<8x32xf32>
    %cst_60 = arith.constant -0.287682086 : f32
    %238 = vector.broadcast %cst_60 : f32 to vector<8x32xf32>
    %239 = arith.addf %237, %238 : vector<8x32xf32>
    %240 = arith.maximumf %222, %239 : vector<8x32xf32>
    %241 = arith.maximumf %240, %226 : vector<8x32xf32>
    %242 = arith.subf %222, %241 : vector<8x32xf32>
    %243 = math.exp %242 : vector<8x32xf32>
    %244 = arith.subf %239, %241 : vector<8x32xf32>
    %245 = math.exp %244 : vector<8x32xf32>
    %246 = arith.addf %243, %245 : vector<8x32xf32>
    %247 = arith.subf %226, %241 : vector<8x32xf32>
    %248 = math.exp %247 : vector<8x32xf32>
    %249 = arith.addf %246, %248 : vector<8x32xf32>
    %250 = math.log %249 : vector<8x32xf32>
    %251 = arith.addf %241, %250 : vector<8x32xf32>
    %c0_61 = arith.constant 0 : index
    %c0_62 = arith.constant 0 : index
    %252 = vector.load %arg8[%c0_61, %c0_62] : memref<8x32xf32, #tpu.memory_space<vmem>>, vector<8x32xf32>
    tpu.vector_store %arg8[%c0_61, %c0_62], %251 {strides = array<i32>} : memref<8x32xf32, #tpu.memory_space<vmem>>, vector<8x32xf32>,
    return
  }
  func.func @transform_0(%arg0: i32) -> (i32, i32) {
    %c0_i32 = arith.constant 0 : i32
    %c0_i32_0 = arith.constant 0 : i32
    return %arg0, %c0_i32 : i32, i32
  }
  func.func @transform_1(%arg0: i32) -> (i32, i32) {
    %c0_i32 = arith.constant 0 : i32
    %c0_i32_0 = arith.constant 0 : i32
    return %arg0, %c0_i32 : i32, i32
  }
  func.func @transform_2(%arg0: i32) -> (i32, i32) {
    %c0_i32 = arith.constant 0 : i32
    %c0_i32_0 = arith.constant 0 : i32
    %c0_i32_1 = arith.constant 0 : i32
    return %c0_i32, %c0_i32_0 : i32, i32
  }
  func.func @transform_3(%arg0: i32) -> (i32, i32, i32) {
    %c0_i32 = arith.constant 0 : i32
    %c0_i32_0 = arith.constant 0 : i32
    %c0_i32_1 = arith.constant 0 : i32
    %c0_i32_2 = arith.constant 0 : i32
    return %c0_i32, %c0_i32_0, %c0_i32_1 : i32, i32, i32
  }
  func.func @transform_4(%arg0: i32) -> (i32, i32) {
    %c0_i32 = arith.constant 0 : i32
    %c0_i32_0 = arith.constant 0 : i32
    %c0_i32_1 = arith.constant 0 : i32
    return %c0_i32, %c0_i32_0 : i32, i32
  }
  func.func @transform_5(%arg0: i32) -> (i32, i32) {
    %c0_i32 = arith.constant 0 : i32
    %c0_i32_0 = arith.constant 0 : i32
    %c0_i32_1 = arith.constant 0 : i32
    return %c0_i32, %c0_i32_0 : i32, i32
  }
  func.func @transform_6(%arg0: i32) -> (i32, i32) {
    %c0_i32 = arith.constant 0 : i32
    %c0_i32_0 = arith.constant 0 : i32
    %c0_i32_1 = arith.constant 0 : i32
    return %c0_i32, %c0_i32_0 : i32, i32
  }
  func.func @transform_7(%arg0: i32) -> (i32, i32) {
    %c0_i32 = arith.constant 0 : i32
    %c0_i32_0 = arith.constant 0 : i32
    return %arg0, %c0_i32 : i32, i32
  }
}

</mosaic_0001>

<bundles_post_ra>
// kernel: tpu_custom_call.1
= control target key start
LH: loop header
LB: loop body
LE: loop exit
PB: predicated region body
PF: predicated region fallthrough
CT: control target
= control target key end

     0   :  { %12 = vsyncpa [#allocation3], 0  ;;  %s1349_s0 = inlined_call_operand.vmem [shape: f32[8,128], index: 0, kind: input, shape index: {}]   ;;  %s1350_s1 = inlined_call_operand.vmem [shape: f32[8,32], index: 1, kind: input, shape index: {}]   ;;  %s1351_s2 = inlined_call_operand.vmem [shape: bf16[128,64], index: 2, kind: input, shape index: {}]   ;;  %s1352_s3 = inlined_call_operand.hbm [shape: bf16[4,64,64], index: 3, kind: input, shape index: {}]   ;;  %s1353_s4 = inlined_call_operand.vmem [shape: bf16[64,64], index: 4, kind: input, shape index: {}]   ;;  %s1354_s5 = inlined_call_operand.vmem [shape: f32[16,64], index: 5, kind: input, shape index: {}]   ;;  %s1355_s6 = inlined_call_operand.vmem [shape: f32[5,32], index: 6, kind: input, shape index: {}]   ;;  %s1356_s7 = inlined_call_operand.hbm [shape: f32[8,32], index: 7, kind: output, shape index: {}]  }
   0x1   :  { %13 = vsyncpa [#allocation4], 0  ;;  %s1101_s24 = smov [#allocation2]   ;;  %s1053_s28 = scalar_lea.hbm %s1352_s3, 2048 }
   0x2   :  { %s25_s25 = sshll.u32 %s1101_s24, 4  ;;  %p1054_p0 = scmp.ne.s32.totalorder %s1352_s3, %s1053_s28  ;;  %s26_s25 = int_to_ptr.vmem [resolvable:$true] %s25_s25 }
   0x3   :  { %p1057_p1 = scmp.lt.u32.totalorder %s1053_s28, %s1352_s3 }
   0x5   :  { %p1059_p2 = pnand %p1057_p1, %p1054_p0 }
   0x7   :  { %1062 = shalt.err (!%p1059_p2)
}
   0x8   :  { %s1063_s10 = scalar_lea.vmem %s26_s25, 2048  ;;  %p1068_p4 = scmp.lt.s32.totalorder %s26_s25, %s26_s25 }
   0x9   :  { %p1064_p3 = scmp.ne.s32.totalorder %s26_s25, %s1063_s10  ;;  %p1069_p5 = scmp.lt.s32.totalorder %s1063_s10, %s1063_s10 }
   0xb   :  { %p1070_p6 = por %p1069_p5, %p1068_p4 }
   0xd   :  { %p1071_p7 = pnand %p1070_p6, %p1064_p3 }
   0xf   :  { %1074 = shalt.err (!%p1071_p7)
}
  0x10   :  { %s1102_s11 = smov 64   ;;  %s1103_s12 = smov 4  }
  0x11   :  { %31 = dma.hbm_to_vmem [thread:$0]  %s1352_s3, 2048, %s26_s25, [#allocation3], %s1102_s11, %s1102_s11, %s1103_s12  }
  0x12   :  { %1097 = dma.done.wait [#allocation3], 2048  }
  0x13   :  { %1098 = vsyncadd [#allocation3], 4294965248  ;;  %v1104_v0 = vmov 0.0   ;;  %v42_v1 = vld [vmem:[%s1349_s0] sm:$0xff]  ;;  %v984_v4 = vld [vmem:[%s1351_s2 + $0x8] sm:$0xff]   ;;  %vm1105_vm0 = vmmov 0   ;;  %v70_v16 = vlaneseq }
  0x14   :  { %895 = vmatprep.subr.bf16.mxu0 %v1104_v0  ;;  %915 = vmatprep.subr.bf16.mxu1 %v1104_v0  ;;  %v47_v2 = vmul.f32 %v42_v1, %v42_v1  ;;  %v983_v3 = vld [vmem:[%s1351_s2] sm:$0xff]   ;;  %v985_v5 = vld [vmem:[%s1351_s2 + $0x10] sm:$0xff]   ;;  %v986_v6 = vld [vmem:[%s1351_s2 + $0x18] sm:$0xff]   ;;  %vm169_vm1 = vcmask 523264   ;;  %s1107_s3 = smov 32   ;;  %vm806_vm2 = vcmask 261120  }
  0x15   :  { %896 = vmatpush3.bf16.msra.mxu0 %v983_v3  ;;  %v987_v7 = vld [vmem:[%s1351_s2 + $0x20] sm:$0xff]   ;;  %v988_v8 = vld [vmem:[%s1351_s2 + $0x28] sm:$0xff]   ;;  %911 = vmatprep.mubr.msk.bf16.mxu0 %vm1105_vm0, %v1104_v0  ;;  %v989_v9 = vld [vmem:[%s1351_s2 + $0x30] sm:$0xff]   ;;  %v1204_v17 = vshrl.u32 %v70_v16, 7 }
  0x16   :  { %48 = vadd.xlane.f32.xlu0 %v47_v2  ;;  %897 = vmatprep.subr.bf16.mxu0 %v1104_v0  ;;  %v990_v10 = vld [vmem:[%s1351_s2 + $0x38] sm:$0xff]   ;;  %v1212_v19 = vld [vmem:[%s1354_s5] sm:$0xff]  ;;  %v992_v35 = vld [vmem:[#allocation2 + $0x8] sm:$0xff]  }
  0x17   :  { %923 = vmatprep.mubr.msk.bf16.mxu1 %vm1105_vm0, %v1104_v0  ;;  %v1207_v18 = vsub.s32 0, %v1204_v17  ;;  %v991_v34 = vld [vmem:[#allocation2] sm:$0xff]   ;;  %v993_v36 = vld [vmem:[#allocation2 + $0x10] sm:$0xff]   ;;  %v994_v37 = vld [vmem:[#allocation2 + $0x18] sm:$0xff]   ;;  %v188_v45 = vsub.s32 5, %v1204_v17  ;;  %v1224_v46 = vsub.s32 2, %v1204_v17 }
  0x18   :  { %916 = vmatpush3.bf16.msra.mxu1 %v991_v34  ;;  %v1229_v47 = vld [vmem:[%s1354_s5 + $0x8] sm:$0xff]  ;;  %v1240_v56 = vsub.s32 1, %v1204_v17 }
  0x19   :  { %898 = vmatpush3.bf16.msra.mxu0 %v984_v4  ;;  %v73_v20 = vrot.slane %v1212_v19, %v1207_v18  ;;  %917 = vmatprep.subr.bf16.mxu1 %v1104_v0  ;;  %v189_v49 = vrot.slane %v1212_v19, %v188_v45  ;;  %v194_v52 = vrot.slane %v1229_v47, %v1224_v46 }
  0x1a   :  { %899 = vmatprep.subr.bf16.mxu0 %v1104_v0  ;;  %v208_v57 = vrot.slane %v1212_v19, %v1240_v56 }
  0x1c   :  { %918 = vmatpush3.bf16.msra.mxu1 %v992_v35 }
  0x1d   :  { %900 = vmatpush3.bf16.msra.mxu0 %v985_v5  ;;  %919 = vmatprep.subr.bf16.mxu1 %v1104_v0 }
  0x1e   :  { %901 = vmatprep.subr.bf16.mxu0 %v1104_v0 }
  0x20   :  { %920 = vmatpush3.bf16.msra.mxu1 %v993_v36 }
  0x21   :  { %902 = vmatpush3.bf16.msra.mxu0 %v986_v6  ;;  %921 = vmatprep.subr.bf16.mxu1 %v1104_v0 }
  0x22   :  { %903 = vmatprep.subr.bf16.mxu0 %v1104_v0 }
  0x24   :  { %922 = vmatpush3.bf16.msra.mxu1 %v994_v37 }
  0x25   :  { %904 = vmatpush3.bf16.msra.mxu0 %v987_v7  ;;  %927 = vmatprep.subr.bf16.mxu1 %v1104_v0 }
  0x26   :  { %905 = vmatprep.subr.bf16.mxu0 %v1104_v0 }
  0x29   :  { %906 = vmatpush3.bf16.msra.mxu0 %v988_v8 }
  0x2a   :  { %907 = vmatprep.subr.bf16.mxu0 %v1104_v0 }
  0x2d   :  { %908 = vmatpush3.bf16.msra.mxu0 %v989_v9  ;;  %v995_v9 = vld [vmem:[#allocation2 + $0x20] sm:$0xff]  }
  0x2e   :  { %909 = vmatprep.subr.bf16.mxu0 %v1104_v0 }
  0x31   :  { %910 = vmatpush3.bf16.msra.mxu0 %v990_v10  ;;  %v996_v10 = vld [vmem:[#allocation2 + $0x28] sm:$0xff]  }
  0x32   :  { %939 = vmatprep.subr.bf16.mxu0 %v1104_v0 }
  0xa3   :  { %v49_v11 = vpop.xlane.xlu0 %48 }
  0xa4   :  { %v50_v12 = vmax.f32 %v49_v11, 1e-24  ;;  %v997_v11 = vld [vmem:[#allocation2 + $0x30] sm:$0xff]  }
  0xa6   :  { %1011 = vrsqrt.f32 %v50_v12  ;;  %v998_v12 = vld [vmem:[#allocation2 + $0x38] sm:$0xff]  }
  0xb0   :  { %v1012_v13 = vpop.eup %1011 }
  0xb1   :  { %v52_v14 = vmul.f32 %v1012_v13, %v42_v1 }
  0xb3   :  { %v69_v15 = vpack.c.bf16 %v52_v14, %v52_v14 }
  0xb5   :  { %912 = vmatmul.mubr.bf16.vlgmr.msra.gmra.mrb[0].mxu0 %v69_v15 }
  0xb6   :  { %947 = vmatprep.mubr.msk.bf16.mxu0 %vm1105_vm0, %v1104_v0 }
 0x188   :  { %v156_v21 = vpop.f32.mrb[0].mxu0 }
 0x189   :  { %v157_v22 = vadd.f32 %v156_v21, %v73_v20  ;;  %v913_v23 = vpop.f32.mrb[1].mxu0 }
 0x18a   :  { %v159_v24 = vpop.f32.mrb[2].mxu0  ;;  %v301_v23 = vsub.s32 6, %v1204_v17 }
 0x18b   :  { %v831_v25 = vmul.f32 -1.442695, %v157_v22  ;;  %v914_v26 = vpop.f32.mrb[3].mxu0  ;;  %v1252_v24 = vsub.s32 3, %v1204_v17 }
 0x18c   :  { %v302_v26 = vrot.slane %v1212_v19, %v301_v23 }
 0x18d   :  { %1013 = vpow2.f32 %v831_v25 }
 0x197   :  { %v1014_v27 = vpop.eup %1013 }
 0x198   :  { %v165_v28 = vadd.f32 1.0, %v1014_v27 }
 0x19a   :  { %1015 = vrcp.f32 %v165_v28 }
 0x1a4   :  { %v1016_v29 = vpop.eup %1015 }
 0x1a5   :  { %v168_v30 = vmul.f32 %v1016_v29, %v157_v22  ;;  %v307_v29 = vrot.slane %v1229_v47, %v1252_v24 }
 0x1a7   :  { %v170_v31 = vsel %vm169_vm1, %v168_v30, 0.0  ;;  %v175_v32 = vmul.f32 %v168_v30, %v168_v30 }
 0x1a8   :  { %171 = vadd.xlane.f32.xlu0 %v170_v31 }
 0x1a9   :  { %v176_v33 = vsel %vm169_vm1, %v175_v32, 0.0 }
 0x1aa   :  { %177 = vadd.xlane.f32.xlu1 %v176_v33  ;;  %v323_v33 = vrot.slane %v1212_v19, %v1224_v46 }
 0x235   :  { %v172_v38 = vpop.xlane.xlu0 %171 }
 0x236   :  { %v174_v39 = vmul.f32 0.015625, %v172_v38 }
 0x237   :  { %v178_v40 = vpop.xlane.xlu1 %177 }
 0x238   :  { %v180_v41 = vmul.f32 %v174_v39, %v174_v39  ;;  %v179_v42 = vmul.f32 0.015625, %v178_v40  ;;  %v182_v48 = vsub.f32 %v168_v30, %v174_v39 }
 0x23a   :  { %v181_v43 = vsub.f32 %v179_v42, %v180_v41 }
 0x23c   :  { %v183_v44 = vadd.f32 0.1, %v181_v43 }
 0x23e   :  { %1017 = vrsqrt.f32 %v183_v44 }
 0x248   :  { %v1018_v50 = vpop.eup %1017 }
 0x249   :  { %v185_v51 = vmul.f32 %v1018_v50, %v182_v48 }
 0x24b   :  { %v190_v53 = vmul.f32 %v189_v49, %v185_v51 }
 0x24d   :  { %v195_v54 = vadd.f32 %v194_v52, %v190_v53  ;;  %v999_v52 = vld [vmem:[#allocation2 + $0x40] sm:$0xff]   ;;  %v1000_v53 = vld [vmem:[#allocation2 + $0x48] sm:$0xff]  }
 0x24e   :  { %940 = vmatpush3.bf16.msra.mxu0 %v999_v52 }
 0x24f   :  { %v204_v55 = vpack.c.bf16 %v195_v54, %v195_v54  ;;  %941 = vmatprep.subr.bf16.mxu0 %v1104_v0 }
 0x251   :  { %924 = vmatmul.mubr.msk.bf16.vlgmr.msra.gmra.mrb[0].mxu1 %vm169_vm1, %v204_v55  ;;  %v1002_v55 = vld [vmem:[#allocation2 + $0x58] sm:$0xff]  }
 0x252   :  { %935 = vmatprep.mubr.msk.bf16.mxu1 %vm1105_vm0, %v1104_v0  ;;  %928 = vmatpush3.bf16.msra.mxu1 %v995_v9 }
 0x253   :  { %929 = vmatprep.subr.bf16.mxu1 %v1104_v0  ;;  %942 = vmatpush3.bf16.msra.mxu0 %v1000_v53 }
 0x254   :  { %943 = vmatprep.subr.bf16.mxu0 %v1104_v0 }
 0x256   :  { %930 = vmatpush3.bf16.msra.mxu1 %v996_v10 }
 0x257   :  { %931 = vmatprep.subr.bf16.mxu1 %v1104_v0 }
 0x25a   :  { %932 = vmatpush3.bf16.msra.mxu1 %v997_v11  ;;  %v438_v11 = vrot.slane %v1212_v19, %v1252_v24 }
 0x25b   :  { %933 = vmatprep.subr.bf16.mxu1 %v1104_v0 }
 0x25e   :  { %934 = vmatpush3.bf16.msra.mxu1 %v998_v12 }
 0x25f   :  { %951 = vmatprep.subr.bf16.mxu1 %v1104_v0 }
 0x324   :  { %v270_v58 = vpop.f32.mrb[0].mxu1 }
 0x325   :  { %v271_v59 = vadd.f32 %v270_v58, %v208_v57  ;;  %v925_v60 = vpop.f32.mrb[1].mxu1 }
 0x326   :  { %v273_v61 = vpop.f32.mrb[2].mxu1 }
 0x327   :  { %v276_v62 = vadd.f32 %v271_v59, %v195_v54  ;;  %v926_v63 = vpop.f32.mrb[3].mxu1 }
 0x329   :  { %v837_v1 = vmul.f32 -1.442695, %v276_v62 }
 0x32b   :  { %1019 = vpow2.f32 %v837_v1  ;;  %v416_v1 = vsub.s32 7, %v1204_v17 }
 0x335   :  { %v1020_v2 = vpop.eup %1019 }
 0x336   :  { %v280_v3 = vadd.f32 1.0, %v1020_v2  ;;  %v1272_v2 = vsub.s32 4, %v1204_v17 }
 0x338   :  { %1021 = vrcp.f32 %v280_v3 }
 0x342   :  { %v1022_v4 = vpop.eup %1021 }
 0x343   :  { %v283_v5 = vmul.f32 %v1022_v4, %v276_v62  ;;  %v417_v4 = vrot.slane %v1212_v19, %v416_v1 }
 0x345   :  { %v284_v6 = vsel %vm169_vm1, %v283_v5, 0.0  ;;  %v288_v7 = vmul.f32 %v283_v5, %v283_v5 }
 0x346   :  { %285 = vadd.xlane.f32.xlu1 %v284_v6 }
 0x347   :  { %v289_v8 = vsel %vm169_vm1, %v288_v7, 0.0  ;;  %v422_v7 = vrot.slane %v1229_v47, %v1272_v2 }
 0x348   :  { %290 = vadd.xlane.f32.xlu0 %v289_v8 }
 0x3d3   :  { %v286_v13 = vpop.xlane.xlu1 %285 }
 0x3d4   :  { %v287_v14 = vmul.f32 0.015625, %v286_v13 }
 0x3d5   :  { %v291_v15 = vpop.xlane.xlu0 %290 }
 0x3d6   :  { %v293_v16 = vmul.f32 %v287_v14, %v287_v14  ;;  %v292_v20 = vmul.f32 0.015625, %v291_v15  ;;  %v295_v25 = vsub.f32 %v283_v5, %v287_v14 }
 0x3d8   :  { %v294_v21 = vsub.f32 %v292_v20, %v293_v16 }
 0x3da   :  { %v296_v22 = vadd.f32 0.1, %v294_v21 }
 0x3dc   :  { %1023 = vrsqrt.f32 %v296_v22 }
 0x3e6   :  { %v1024_v27 = vpop.eup %1023 }
 0x3e7   :  { %v298_v28 = vmul.f32 %v1024_v27, %v295_v25 }
 0x3e9   :  { %v303_v30 = vmul.f32 %v302_v26, %v298_v28 }
 0x3eb   :  { %v308_v31 = vadd.f32 %v307_v29, %v303_v30 }
 0x3ed   :  { %v319_v32 = vpack.c.bf16 %v308_v31, %v308_v31  ;;  %v309_v35 = vadd.f32 %v308_v31, %v195_v54  ;;  %v1001_v54 = vld [vmem:[#allocation2 + $0x50] sm:$0xff]  }
 0x3ee   :  { %944 = vmatpush3.bf16.msra.mxu0 %v1001_v54  ;;  %v553_v54 = vrot.slane %v1212_v19, %v1272_v2 }
 0x3ef   :  { %936 = vmatmul.mubr.msk.bf16.vlgmr.msra.gmra.mrb[4].mxu1 %vm169_vm1, %v319_v32  ;;  %945 = vmatprep.subr.bf16.mxu0 %v1104_v0  ;;  %v1003_v32 = vld [vmem:[#allocation2 + $0x60] sm:$0xff]  }
 0x3f0   :  { %959 = vmatprep.mubr.msk.bf16.mxu1 %vm1105_vm0, %v1104_v0  ;;  %952 = vmatpush3.bf16.msra.mxu1 %v1003_v32 }
 0x3f1   :  { %953 = vmatprep.subr.bf16.mxu1 %v1104_v0 }
 0x3f2   :  { %946 = vmatpush3.bf16.msra.mxu0 %v1002_v55 }
 0x3f3   :  { %963 = vmatprep.subr.bf16.mxu0 %v1104_v0 }
 0x4c2   :  { %v385_v34 = vpop.f32.mrb[4].mxu1 }
 0x4c3   :  { %v386_v36 = vadd.f32 %v385_v34, %v323_v33  ;;  %v937_v37 = vpop.f32.mrb[5].mxu1  ;;  %v1004_v33 = vld [vmem:[#allocation2 + $0x68] sm:$0xff]   ;;  %v1005_v34 = vld [vmem:[#allocation2 + $0x70] sm:$0xff]  }
 0x4c4   :  { %v388_v38 = vpop.f32.mrb[6].mxu1  ;;  %954 = vmatpush3.bf16.msra.mxu1 %v1004_v33 }
 0x4c5   :  { %v391_v39 = vadd.f32 %v386_v36, %v309_v35  ;;  %v938_v40 = vpop.f32.mrb[7].mxu1  ;;  %955 = vmatprep.subr.bf16.mxu1 %v1104_v0 }
 0x4c7   :  { %v843_v41 = vmul.f32 -1.442695, %v391_v39 }
 0x4c8   :  { %956 = vmatpush3.bf16.msra.mxu1 %v1005_v34 }
 0x4c9   :  { %1025 = vpow2.f32 %v843_v41  ;;  %957 = vmatprep.subr.bf16.mxu1 %v1104_v0 }
 0x4d3   :  { %v1026_v42 = vpop.eup %1025 }
 0x4d4   :  { %v395_v43 = vadd.f32 1.0, %v1026_v42 }
 0x4d6   :  { %1027 = vrcp.f32 %v395_v43  ;;  %v532_v43 = vrot.slane %v1229_v47, %v1207_v18 }
 0x4e0   :  { %v1028_v44 = vpop.eup %1027 }
 0x4e1   :  { %v398_v48 = vmul.f32 %v1028_v44, %v391_v39 }
 0x4e3   :  { %v399_v49 = vsel %vm169_vm1, %v398_v48, 0.0  ;;  %v403_v50 = vmul.f32 %v398_v48, %v398_v48 }
 0x4e4   :  { %400 = vadd.xlane.f32.xlu1 %v399_v49 }
 0x4e5   :  { %v404_v51 = vsel %vm169_vm1, %v403_v50, 0.0  ;;  %v537_v50 = vrot.slane %v1229_v47, %v188_v45 }
 0x4e6   :  { %405 = vadd.xlane.f32.xlu0 %v404_v51 }
 0x571   :  { %v401_v57 = vpop.xlane.xlu1 %400 }
 0x572   :  { %v402_v58 = vmul.f32 0.015625, %v401_v57 }
 0x573   :  { %v406_v59 = vpop.xlane.xlu0 %405 }
 0x574   :  { %v408_v60 = vmul.f32 %v402_v58, %v402_v58  ;;  %v407_v61 = vmul.f32 0.015625, %v406_v59  ;;  %v410_v3 = vsub.f32 %v398_v48, %v402_v58 }
 0x576   :  { %v409_v62 = vsub.f32 %v407_v61, %v408_v60 }
 0x578   :  { %v411_v63 = vadd.f32 0.1, %v409_v62 }
 0x57a   :  { %1029 = vrsqrt.f32 %v411_v63 }
 0x584   :  { %v1030_v5 = vpop.eup %1029 }
 0x585   :  { %v413_v6 = vmul.f32 %v1030_v5, %v410_v3 }
 0x587   :  { %v418_v8 = vmul.f32 %v417_v4, %v413_v6 }
 0x589   :  { %v423_v9 = vadd.f32 %v422_v7, %v418_v8  ;;  %v1007_v8 = vld [vmem:[%s1353_s4] sm:$0xff]  }
 0x58b   :  { %v434_v10 = vpack.c.bf16 %v423_v9, %v423_v9  ;;  %v424_v13 = vadd.f32 %v423_v9, %v309_v35  ;;  %v1006_v35 = vld [vmem:[#allocation2 + $0x78] sm:$0xff]   ;;  %v1008_v9 = vld [vmem:[%s1353_s4 + $0x8] sm:$0xff]  }
 0x58c   :  { %958 = vmatpush3.bf16.msra.mxu1 %v1006_v35 }
 0x58d   :  { %948 = vmatmul.mubr.msk.bf16.vlgmr.msra.gmra.mrb[4].mxu0 %vm169_vm1, %v434_v10  ;;  %v1009_v10 = vld [vmem:[%s1353_s4 + $0x10] sm:$0xff]  }
 0x58e   :  { %971 = vmatprep.mubr.msk.bf16.mxu0 %vm1105_vm0, %v1104_v0  ;;  %964 = vmatpush3.bf16.msra.mxu0 %v1007_v8 }
 0x58f   :  { %965 = vmatprep.subr.bf16.mxu0 %v1104_v0 }
 0x592   :  { %966 = vmatpush3.bf16.msra.mxu0 %v1008_v9 }
 0x593   :  { %967 = vmatprep.subr.bf16.mxu0 %v1104_v0 }
 0x596   :  { %968 = vmatpush3.bf16.msra.mxu0 %v1009_v10 }
 0x597   :  { %969 = vmatprep.subr.bf16.mxu0 %v1104_v0 }
 0x660   :  { %v500_v12 = vpop.f32.mrb[4].mxu0 }
 0x661   :  { %v501_v14 = vadd.f32 %v500_v12, %v438_v11  ;;  %v949_v15 = vpop.f32.mrb[5].mxu0  ;;  %v1010_v11 = vld [vmem:[%s1353_s4 + $0x18] sm:$0xff]   ;;  %s1106_s4 = smov 96  }
 0x662   :  { %v503_v16 = vpop.f32.mrb[6].mxu0  ;;  %970 = vmatpush3.bf16.msra.mxu0 %v1010_v11 }
 0x663   :  { %v506_v20 = vadd.f32 %v501_v14, %v424_v13  ;;  %v950_v21 = vpop.f32.mrb[7].mxu0 }
 0x665   :  { %v849_v22 = vmul.f32 -1.442695, %v506_v20 }
 0x667   :  { %1031 = vpow2.f32 %v849_v22  ;;  %v647_v22 = vrot.slane %v1229_v47, %v1240_v56 }
 0x671   :  { %v1032_v25 = vpop.eup %1031 }
 0x672   :  { %v510_v26 = vadd.f32 1.0, %v1032_v25 }
 0x674   :  { %1033 = vrcp.f32 %v510_v26 }
 0x67e   :  { %v1034_v27 = vpop.eup %1033 }
 0x67f   :  { %v513_v28 = vmul.f32 %v1034_v27, %v506_v20 }
 0x681   :  { %v514_v29 = vsel %vm169_vm1, %v513_v28, 0.0  ;;  %v518_v30 = vmul.f32 %v513_v28, %v513_v28 }
 0x682   :  { %515 = vadd.xlane.f32.xlu1 %v514_v29 }
 0x683   :  { %v519_v31 = vsel %vm169_vm1, %v518_v30, 0.0 }
 0x684   :  { %520 = vadd.xlane.f32.xlu0 %v519_v31  ;;  %v666_v31 = vrot.slane %v1229_v47, %v416_v1 }
 0x70f   :  { %v516_v36 = vpop.xlane.xlu1 %515 }
 0x710   :  { %v517_v37 = vmul.f32 0.015625, %v516_v36 }
 0x711   :  { %v521_v38 = vpop.xlane.xlu0 %520 }
 0x712   :  { %v523_v39 = vmul.f32 %v517_v37, %v517_v37  ;;  %v522_v40 = vmul.f32 0.015625, %v521_v38  ;;  %v525_v44 = vsub.f32 %v513_v28, %v517_v37  ;;  %v652_v28 = vrot.slane %v1229_v47, %v301_v23  ;;  %v43_v23 = vld [vmem:[%s1350_s1] sm:$0xff]  ;;  %s1108_s1 = smov [#allocation5]  }
 0x714   :  { %v524_v41 = vsub.f32 %v522_v40, %v523_v39 }
 0x716   :  { %v526_v42 = vadd.f32 0.1, %v524_v41 }
 0x718   :  { %1035 = vrsqrt.f32 %v526_v42 }
 0x722   :  { %v1036_v48 = vpop.eup %1035 }
 0x723   :  { %v528_v49 = vmul.f32 %v1036_v48, %v525_v44 }
 0x725   :  { %v533_v51 = vmul.f32 %v532_v43, %v528_v49  ;;  %v46_v49 = vld [vmem:[%s1355_s6] sm:$0x1f]  ;;  %s814_s6 = sshll.u32 %s1108_s1, 4  ;;  %s815_s6 = int_to_ptr.vmem [resolvable:$true] %s814_s6 }
 0x726   :  { %s1075_s0 = scalar_lea.vmem %s815_s6, 128  ;;  %p1080_p9 = scmp.lt.s32.totalorder %s815_s6, %s815_s6 }
 0x727   :  { %v538_v52 = vadd.f32 %v537_v50, %v533_v51  ;;  %v737_v50 = vrot.slane %v46_v49, %v1207_v18  ;;  %p1076_p8 = scmp.ne.s32.totalorder %s815_s6, %s1075_s0  ;;  %p1081_p10 = scmp.lt.s32.totalorder %s1075_s0, %s1075_s0 }
 0x729   :  { %v549_v53 = vpack.c.bf16 %v538_v52, %v538_v52  ;;  %v539_v57 = vadd.f32 %v538_v52, %v424_v13  ;;  %v738_v51 = vsub.f32 %v43_v23, %v737_v50  ;;  %p1082_p11 = por %p1081_p10, %p1080_p9 }
 0x72b   :  { %960 = vmatmul.mubr.msk.bf16.vlgmr.msra.gmra.mrb[8].mxu1 %vm169_vm1, %v549_v53  ;;  %v739_v52 = vmul.f32 %v738_v51, %v738_v51  ;;  %v743_v53 = vrot.slane %v46_v49, %v1240_v56  ;;  %p1083_p12 = pnand %p1082_p11, %p1076_p8 }
 0x7fe   :  { %v615_v55 = vpop.f32.mrb[8].mxu1 }
 0x7ff   :  { %v616_v58 = vadd.f32 %v615_v55, %v553_v54  ;;  %v961_v59 = vpop.f32.mrb[9].mxu1  ;;  %v753_v54 = vrot.slane %v46_v49, %v1252_v24  ;;  %v744_v55 = vmul.f32 %v743_v53, %v739_v52 }
 0x800   :  { %v618_v60 = vpop.f32.mrb[10].mxu1  ;;  %v758_v59 = vrot.slane %v46_v49, %v1272_v2 }
 0x801   :  { %v621_v61 = vadd.f32 %v616_v58, %v539_v57  ;;  %v962_v62 = vpop.f32.mrb[11].mxu1  ;;  %v748_v57 = vrot.slane %v46_v49, %v1224_v46  ;;  %v754_v58 = vmul.f32 %v753_v54, %v739_v52 }
 0x803   :  { %v855_v63 = vmul.f32 -1.442695, %v621_v61  ;;  %v749_v60 = vadd.f32 %v748_v57, %v744_v55 }
 0x805   :  { %1037 = vpow2.f32 %v855_v63 }
 0x80f   :  { %v1038_v3 = vpop.eup %1037 }
 0x810   :  { %v625_v4 = vadd.f32 1.0, %v1038_v3 }
 0x812   :  { %1039 = vrcp.f32 %v625_v4 }
 0x81c   :  { %v1040_v45 = vpop.eup %1039 }
 0x81d   :  { %v628_v5 = vmul.f32 %v1040_v45, %v621_v61  ;;  %v759_v61 = vadd.f32 %v758_v59, %v754_v58 }
 0x81f   :  { %v629_v6 = vsel %vm169_vm1, %v628_v5, 0.0  ;;  %v633_v7 = vmul.f32 %v628_v5, %v628_v5 }
 0x820   :  { %630 = vadd.xlane.f32.xlu1 %v629_v6 }
 0x821   :  { %v634_v19 = vsel %vm169_vm1, %v633_v7, 0.0 }
 0x822   :  { %635 = vadd.xlane.f32.xlu0 %v634_v19 }
 0x8ad   :  { %v631_v12 = vpop.xlane.xlu1 %630 }
 0x8ae   :  { %v632_v13 = vmul.f32 0.015625, %v631_v12 }
 0x8af   :  { %v636_v14 = vpop.xlane.xlu0 %635 }
 0x8b0   :  { %v638_v15 = vmul.f32 %v632_v13, %v632_v13  ;;  %v637_v16 = vmul.f32 0.015625, %v636_v14  ;;  %v640_v25 = vsub.f32 %v628_v5, %v632_v13 }
 0x8b2   :  { %v639_v20 = vsub.f32 %v637_v16, %v638_v15 }
 0x8b4   :  { %v641_v21 = vadd.f32 0.1, %v639_v20 }
 0x8b6   :  { %1041 = vrsqrt.f32 %v641_v21 }
 0x8c0   :  { %v1042_v26 = vpop.eup %1041 }
 0x8c1   :  { %v643_v27 = vmul.f32 %v1042_v26, %v640_v25 }
 0x8c3   :  { %v648_v0 = vmul.f32 %v647_v22, %v643_v27 }
 0x8c5   :  { %v653_v29 = vadd.f32 %v652_v28, %v648_v0 }
 0x8c7   :  { %v662_v30 = vpack.c.bf16 %v653_v29, %v653_v29 }
 0x8c9   :  { %972 = vmatmul.mubr.msk.bf16.vlgmr.msra.gmra.mrb[8].mxu0 %vm169_vm1, %v662_v30 }
 0x99c   :  { %v728_v32 = vpop.f32.mrb[8].mxu0 }
 0x99d   :  { %v729_v33 = vadd.f32 %v728_v32, %v666_v31  ;;  %v973_v34 = vpop.f32.mrb[9].mxu0 }
 0x99e   :  { %v731_v35 = vpop.f32.mrb[10].mxu0 }
 0x99f   :  { %v763_v36 = vsub.f32 0.0, %v729_v33  ;;  %v974_v37 = vpop.f32.mrb[11].mxu0  ;;  %v761_v40 = vsub.f32 %v43_v23, %v729_v33  ;;  %v760_v1 = vadd.f32 1.837877, %v729_v33 }
 0x9a1   :  { %v764_v38 = vmul.f32 1.442695, %v763_v36  ;;  %v762_v17 = vmul.f32 %v761_v40, %v761_v40 }
 0x9a3   :  { %1043 = vpow2.f32 %v764_v38 }
 0x9ad   :  { %v1044_v39 = vpop.eup %1043 }
 0x9ae   :  { %767 = vrot.lane.b32.xlu1 %v1044_v39, %s1106_s4 }
 0xa20   :  { %v768_v41 = vpop.permute.xlu1 %767 }
 0xa21   :  { %v770_v47 = vmul.f32 %v768_v41, %v762_v17 }
 0xa23   :  { %772 = vrot.lane.b32.xlu0 %v770_v47, %s1107_s3 }
 0xa95   :  { %v773_v42 = vpop.permute.xlu0 %772 }
 0xa96   :  { %v775_v43 = vadd.f32 %v773_v42, %v760_v1 }
 0xa98   :  { %v776_v44 = vmul.f32 -0.5, %v775_v43 }
 0xa9a   :  { %v777_v48 = vadd.f32 -0.2876821, %v776_v44 }
 0xa9c   :  { %779 = vrot.lane.b32.xlu1 %v777_v48, %s1106_s4 }
 0xb0e   :  { %v780_v62 = vpop.permute.xlu1 %779 }
 0xb0f   :  { %v782_v63 = vmax.f32 %v749_v60, %v780_v62 }
 0xb11   :  { %v783_v3 = vmax.f32 %v782_v63, %v759_v61 }
 0xb13   :  { %788 = vrot.lane.b32.xlu1 %v783_v3, %s1107_s3  ;;  %v784_v56 = vsub.f32 %v749_v60, %v783_v3  ;;  %v799_v24 = vsub.f32 %v759_v61, %v783_v3 }
 0xb15   :  { %v785_v6 = vmul.f32 1.442695, %v784_v56  ;;  %v800_v46 = vmul.f32 1.442695, %v799_v24 }
 0xb85   :  { %v789_v4 = vpop.permute.xlu1 %788 }
 0xb86   :  { %v791_v18 = vsub.f32 %v777_v48, %v789_v4 }
 0xb88   :  { %v792_v45 = vmul.f32 1.442695, %v791_v18 }
 0xb8a   :  { %1045 = vpow2.f32 %v792_v45 }
 0xb8b   :  { %1047 = vpow2.f32 %v785_v6 }
 0xb8c   :  { %1049 = vpow2.f32 %v800_v46 }
 0xb94   :  { %v1046_v5 = vpop.eup %1045 }
 0xb95   :  { %795 = vrot.lane.b32.xlu1 %v1046_v5, %s1106_s4  ;;  %v1048_v2 = vpop.eup %1047 }
 0xb96   :  { %v1050_v8 = vpop.eup %1049 }
 0xc07   :  { %v796_v7 = vpop.permute.xlu1 %795 }
 0xc08   :  { %v798_v19 = vadd.f32 %v1048_v2, %v796_v7 }
 0xc0a   :  { %v802_v9 = vadd.f32 %v1050_v8, %v798_v19 }
 0xc0c   :  { %1051 = vlog2.f32 %v802_v9 }
 0xc16   :  { %v1052_v10 = vpop.eup %1051 }
 0xc17   :  { %v804_v11 = vmul.f32 0.6931472, %v1052_v10 }
 0xc19   :  { %v805_v12 = vadd.f32 %v804_v11, %v783_v3 }
 0xc1b   :  { %807 = vst.msk [vmem:[#allocation5] sm:$0xff] %vm806_vm2, %v805_v12 }
 0xc1c   :  { %1086 = shalt.err (!%p1083_p12)
}
 0xc1d   :  { %s1087_s24 = scalar_lea.hbm %s1356_s7, 128 }
 0xc1e   :  { %p1088_p13 = scmp.ne.s32.totalorder %s1356_s7, %s1087_s24  ;;  %p1091_p0 = scmp.lt.u32.totalorder %s1087_s24, %s1356_s7 }
 0xc20   :  { %p1093_p1 = pnand %p1091_p0, %p1088_p13 }
 0xc22   :  { %1096 = shalt.err (!%p1093_p1)
}
 0xc23   :  { %817 = dma.vmem_to_hbm [thread:$0]  %s815_s6, 128, %s1356_s7, [#allocation4]  }
 0xc24   :  { %1099 = dma.done.wait [#allocation4], 128  }
 0xc25   :  { %1100 = vsyncadd [#allocation4], 4294967168 }
 0xc26   :  { %821 = vsyncpa [#allocation3], 1 }
 0xc27   :  { %822 = vsyncpa [#allocation4], 1 }

</bundles_post_ra>
